<compile_context>
chip_gen: v7x
topology: tpu7x:2x2x1
jax: 0.10.0
libtpu: 0.0.40
codegen_flags: <defaults>
</compile_context>

<pallas_src>
import math
from functools import partial

import jax
import jax.numpy as jnp
from jax import lax
from jax.experimental import pallas as pl
from jax.experimental.pallas import tpu as pltpu

# ----- "AttentionConfig" -----
DIM = 32                 # model dim (input/output of the attention layer)
NUM_HEADS = 4
NUM_QUERY_GROUPS = 2     # GQA: 2 query heads share each kv head
HEAD_DIM = 8
Q_PER_KV = NUM_HEADS // NUM_QUERY_GROUPS
QKV_SHAPE = (NUM_HEADS + 2 * NUM_QUERY_GROUPS) * HEAD_DIM   # 64
OUT_SHAPE = NUM_HEADS * HEAD_DIM                            # 32
SCALE = 1.0 / math.sqrt(HEAD_DIM)
NEG_INF = -1e30          # large finite negative (avoids exp(-inf - -inf) NaN)

B, T = 2, 8

# Lane offsets inside the *permuted* qkv activation: [Q (32) | K (16) | V (16)]
Q_BLK = NUM_HEADS * HEAD_DIM                 # 32
K_OFF = Q_BLK                                # 32
V_OFF = Q_BLK + NUM_QUERY_GROUPS * HEAD_DIM  # 48


def _causal_attn_kernel(x_ref, wqkv_ref, wout_ref, o_ref, *, batch, seq):
  """Single gridless invocation: the whole (B*T, DIM) problem lives in VMEM."""
  x = x_ref[...]            # (B*T, DIM)
  wqkv = wqkv_ref[...]      # (DIM, QKV_SHAPE), columns permuted, Q pre-scaled
  wout = wout_ref[...]      # (OUT_SHAPE, DIM)

  # One fused QKV projection for all batches (single MXU push).
  qkv = jnp.dot(x, wqkv, preferred_element_type=jnp.float32)   # (B*T, 64)

  # In-kernel causal mask (boolean), shared across batches / heads.
  row = lax.broadcasted_iota(jnp.int32, (seq, seq), 0)
  col = lax.broadcasted_iota(jnp.int32, (seq, seq), 1)
  causal = col <= row

  batch_outs = []
  for b in range(batch):                  # static, unrolled (batch == 2)
    r0 = b * seq
    qkv_b = qkv[r0:r0 + seq, :]           # (T, 64), aligned sublane slice
    head_outs = []
    for g in range(NUM_QUERY_GROUPS):     # slice K/V once per KV group
      k_g = qkv_b[:, K_OFF + g * HEAD_DIM: K_OFF + (g + 1) * HEAD_DIM]  # (T, HD)
      v_g = qkv_b[:, V_OFF + g * HEAD_DIM: V_OFF + (g + 1) * HEAD_DIM]  # (T, HD)
      for w in range(Q_PER_KV):
        h = g * Q_PER_KV + w
        q_h = qkv_b[:, h * HEAD_DIM: (h + 1) * HEAD_DIM]                # (T, HD)

        # scores = (q * SCALE) @ k^T  (scale already folded into W_q columns)
        scores = lax.dot_general(
            q_h, k_g, (((1,), (1,)), ((), ())),
            preferred_element_type=jnp.float32)                         # (T, T)
        scores = jnp.where(causal, scores, NEG_INF)

        m = jnp.max(scores, axis=-1, keepdims=True)
        p = jnp.exp(scores - m)
        denom = jnp.sum(p, axis=-1, keepdims=True)
        pv = jnp.dot(p, v_g, preferred_element_type=jnp.float32)        # (T, HD)
        head_outs.append(pv / denom)      # exact divide: bit-parity w/ reference

    # lane-axis "concat" of the heads: a handful of in-vreg selects.
    batch_outs.append(jnp.concatenate(head_outs, axis=1))               # (T, 32)

  sdpa = jnp.concatenate(batch_outs, axis=0)                            # (B*T, 32)
  # Single output projection for all batches / heads (one MXU push, one store).
  # Note: last dim 32 < 128 lanes -> masked stores; architectural floor of the
  # model config, not worth fighting at this size.
  o_ref[...] = jnp.dot(sdpa, wout, preferred_element_type=jnp.float32)


def _permute_and_scale_qkv_weight(w_qkv):
  """One-time constant transform of the QKV projection weight.

  Reorders the columns from the qkv_transpose_before_split=False layout
  (per-group [q .. q, k, v] blocks) into [all Q heads | all K groups |
  all V groups], and folds the 1/sqrt(head_dim) attention scale into the
  query columns.  Free at runtime (constant weight), and it lets the kernel
  slice contiguous lane blocks at uniform offsets.
  """
  per_group = (Q_PER_KV + 2) * HEAD_DIM
  q_cols, k_cols, v_cols = [], [], []
  for g in range(NUM_QUERY_GROUPS):
    base = g * per_group
    q_cols.extend(range(base, base + Q_PER_KV * HEAD_DIM))
    k_cols.extend(range(base + Q_PER_KV * HEAD_DIM,
                        base + (Q_PER_KV + 1) * HEAD_DIM))
    v_cols.extend(range(base + (Q_PER_KV + 1) * HEAD_DIM,
                        base + (Q_PER_KV + 2) * HEAD_DIM))
  perm = jnp.asarray(q_cols + k_cols + v_cols, dtype=jnp.int32)
  w = jnp.take(w_qkv, perm, axis=1)
  col_scale = jnp.concatenate([
      jnp.full((Q_BLK,), SCALE, dtype=w_qkv.dtype),
      jnp.ones((QKV_SHAPE - Q_BLK,), dtype=w_qkv.dtype)])
  return w * col_scale[None, :]


def causal_self_attention(x, w_qkv, w_out):
  """x: (B, T, DIM) f32; w_qkv: (DIM, QKV_SHAPE); w_out: (OUT_SHAPE, DIM)."""
  Bb, Tt, Dd = x.shape
  w_qkv_p = _permute_and_scale_qkv_weight(w_qkv)
  x2d = x.reshape(Bb * Tt, Dd)     # fold batch into sublanes -> one invocation
  out2d = pl.pallas_call(
      partial(_causal_attn_kernel, batch=Bb, seq=Tt),
      out_shape=jax.ShapeDtypeStruct((Bb * Tt, Dd), jnp.float32),
      in_specs=[
          pl.BlockSpec(memory_space=pltpu.MemorySpace.VMEM),
          pl.BlockSpec(memory_space=pltpu.MemorySpace.VMEM),
          pl.BlockSpec(memory_space=pltpu.MemorySpace.VMEM),
      ],
      out_specs=pl.BlockSpec(memory_space=pltpu.MemorySpace.VMEM),
  )(x2d, w_qkv_p, w_out)
  return out2d.reshape(Bb, Tt, Dd)


def _reference(x, w_qkv, w_out):
  """Pure-JAX mirror of the PyTorch forward (no rope/lora/kv_cache/mask)."""
  Bb, Tt, _ = x.shape
  qkv = jnp.einsum("btd,de->bte", x, w_qkv)
  per_group = (Q_PER_KV + 2) * HEAD_DIM
  qkv = qkv.reshape(Bb, Tt, NUM_QUERY_GROUPS, per_group)
  q = qkv[..., : Q_PER_KV * HEAD_DIM]
  k = qkv[..., Q_PER_KV * HEAD_DIM: Q_PER_KV * HEAD_DIM + HEAD_DIM]
  v = qkv[..., Q_PER_KV * HEAD_DIM + HEAD_DIM:]
  q = q.reshape(Bb, Tt, NUM_HEADS, HEAD_DIM)
  k = k.reshape(Bb, Tt, NUM_QUERY_GROUPS, HEAD_DIM)
  v = v.reshape(Bb, Tt, NUM_QUERY_GROUPS, HEAD_DIM)
  # identity query/key/value norms (NormalizationConfig NONE)
  k = jnp.repeat(k, Q_PER_KV, axis=2)
  v = jnp.repeat(v, Q_PER_KV, axis=2)
  scores = jnp.einsum("bqhd,bkhd->bhqk", q, k) * SCALE
  row = lax.broadcasted_iota(jnp.int32, (Tt, Tt), 0)
  col = lax.broadcasted_iota(jnp.int32, (Tt, Tt), 1)
  scores = jnp.where((col <= row)[None, None], scores, NEG_INF)
  probs = jax.nn.softmax(scores, axis=-1)
  out = jnp.einsum("bhqk,bkhd->bqhd", probs, v).reshape(Bb, Tt, OUT_SHAPE)
  return jnp.einsum("bto,od->btd", out, w_out)


if __name__ == "__main__":
  key = jax.random.PRNGKey(0)
  kx, kq, ko = jax.random.split(key, 3)

  x = jax.random.normal(kx, (B, T, DIM), dtype=jnp.float32)
  # deterministic synthetic weights (nn.Linear-shaped, stored transposed)
  w_qkv = jax.random.normal(kq, (DIM, QKV_SHAPE), dtype=jnp.float32) * 0.05
  w_out = jax.random.normal(ko, (OUT_SHAPE, DIM), dtype=jnp.float32) * 0.05

  y = jax.block_until_ready(causal_self_attention(x, w_qkv, w_out))
  y_ref = _reference(x, w_qkv, w_out)
  assert y.shape == (B, T, DIM)
  # exact softmax divide + pre-scaled constant weights -> tight tolerance
  assert jnp.allclose(y, y_ref, atol=1e-4, rtol=1e-4), "mismatch vs reference"
  print("KERNEL_OK")
</pallas_src>

<mosaic_0001>
module attributes {stable_mosaic.version = 11 : i64} {
  func.func @_causal_attn_kernel(%arg0: memref<16x32xf32, #tpu.memory_space<vmem>>, %arg1: memref<32x64xf32, #tpu.memory_space<vmem>>, %arg2: memref<32x32xf32, #tpu.memory_space<vmem>>, %arg3: memref<16x32xf32, #tpu.memory_space<vmem>>) attributes {dimension_semantics = [], scalar_prefetch = 0 : i64, scratch_operands = 0 : i64, tpu.core_type = #tpu.core_type<tc>} {
    %c0 = arith.constant 0 : index
    %c0_0 = arith.constant 0 : index
    %0 = vector.load %arg0[%c0, %c0_0] : memref<16x32xf32, #tpu.memory_space<vmem>>, vector<16x32xf32>
    %c0_1 = arith.constant 0 : index
    %c0_2 = arith.constant 0 : index
    %1 = vector.load %arg1[%c0_1, %c0_2] : memref<32x64xf32, #tpu.memory_space<vmem>>, vector<32x64xf32>
    %c0_3 = arith.constant 0 : index
    %c0_4 = arith.constant 0 : index
    %2 = vector.load %arg2[%c0_3, %c0_4] : memref<32x32xf32, #tpu.memory_space<vmem>>, vector<32x32xf32>
    %cst = arith.constant dense<0.000000e+00> : vector<16x64xf32>
    %3 = tpu.matmul %0, %1, %cst {dimension_numbers = #tpu.dot_dimension_numbers<[1], [0], [0], [1], [0, 0, 1, 1], [], []>} : vector<16x32xf32>, vector<32x64xf32>, vector<16x64xf32> -> vector<16x64xf32>
    %4 = tpu.iota {dimensions = array<i32: 0>} : vector<8x8xi32>
    %5 = tpu.iota {dimensions = array<i32: 1>} : vector<8x8xi32>
    %6 = arith.cmpi sle, %5, %4 : vector<8x8xi32>
    %7 = vector.extract_strided_slice %3 {offsets = [0, 0], sizes = [8, 64], strides = [1, 1]} : vector<16x64xf32> to vector<8x64xf32>
    %8 = vector.extract_strided_slice %7 {offsets = [0, 32], sizes = [8, 8], strides = [1, 1]} : vector<8x64xf32> to vector<8x8xf32>
    %9 = vector.extract_strided_slice %7 {offsets = [0, 48], sizes = [8, 8], strides = [1, 1]} : vector<8x64xf32> to vector<8x8xf32>
    %10 = vector.extract_strided_slice %7 {offsets = [0, 0], sizes = [8, 8], strides = [1, 1]} : vector<8x64xf32> to vector<8x8xf32>
    %cst_5 = arith.constant dense<0.000000e+00> : vector<8x8xf32>
    %11 = tpu.matmul %10, %8, %cst_5 {dimension_numbers = #tpu.dot_dimension_numbers<[1], [1], [0], [0], [0, 0, 1, 0], [], []>} : vector<8x8xf32>, vector<8x8xf32>, vector<8x8xf32> -> vector<8x8xf32>
    %cst_6 = arith.constant -1.000000e+30 : f32
    %12 = vector.broadcast %cst_6 : f32 to vector<8x8xf32>
    %13 = arith.select %6, %11, %12 : vector<8x8xi1>, vector<8x8xf32>
    %cst_7 = arith.constant dense<0xFF800000> : vector<8xf32>
    %14 = vector.multi_reduction <maximumf>, %13, %cst_7 [1] : vector<8x8xf32> to vector<8xf32>
    %15 = vector.shape_cast %14 : vector<8xf32> to vector<8x1xf32>
    %16 = vector.broadcast %15 : vector<8x1xf32> to vector<8x8xf32>
    %17 = arith.subf %13, %16 : vector<8x8xf32>
    %18 = math.exp %17 : vector<8x8xf32>
    %cst_8 = arith.constant dense<0.000000e+00> : vector<8xf32>
    %19 = vector.multi_reduction <add>, %18, %cst_8 [1] : vector<8x8xf32> to vector<8xf32>
    %20 = vector.shape_cast %19 : vector<8xf32> to vector<8x1xf32>
    %cst_9 = arith.constant dense<0.000000e+00> : vector<8x8xf32>
    %21 = tpu.matmul %18, %9, %cst_9 {dimension_numbers = #tpu.dot_dimension_numbers<[1], [0], [0], [1], [0, 0, 1, 1], [], []>} : vector<8x8xf32>, vector<8x8xf32>, vector<8x8xf32> -> vector<8x8xf32>
    %22 = vector.broadcast %20 : vector<8x1xf32> to vector<8x8xf32>
    %23 = arith.divf %21, %22 : vector<8x8xf32>
    %24 = vector.extract_strided_slice %7 {offsets = [0, 8], sizes = [8, 8], strides = [1, 1]} : vector<8x64xf32> to vector<8x8xf32>
    %cst_10 = arith.constant dense<0.000000e+00> : vector<8x8xf32>
    %25 = tpu.matmul %24, %8, %cst_10 {dimension_numbers = #tpu.dot_dimension_numbers<[1], [1], [0], [0], [0, 0, 1, 0], [], []>} : vector<8x8xf32>, vector<8x8xf32>, vector<8x8xf32> -> vector<8x8xf32>
    %cst_11 = arith.constant -1.000000e+30 : f32
    %26 = vector.broadcast %cst_11 : f32 to vector<8x8xf32>
    %27 = arith.select %6, %25, %26 : vector<8x8xi1>, vector<8x8xf32>
    %cst_12 = arith.constant dense<0xFF800000> : vector<8xf32>
    %28 = vector.multi_reduction <maximumf>, %27, %cst_12 [1] : vector<8x8xf32> to vector<8xf32>
    %29 = vector.shape_cast %28 : vector<8xf32> to vector<8x1xf32>
    %30 = vector.broadcast %29 : vector<8x1xf32> to vector<8x8xf32>
    %31 = arith.subf %27, %30 : vector<8x8xf32>
    %32 = math.exp %31 : vector<8x8xf32>
    %cst_13 = arith.constant dense<0.000000e+00> : vector<8xf32>
    %33 = vector.multi_reduction <add>, %32, %cst_13 [1] : vector<8x8xf32> to vector<8xf32>
    %34 = vector.shape_cast %33 : vector<8xf32> to vector<8x1xf32>
    %cst_14 = arith.constant dense<0.000000e+00> : vector<8x8xf32>
    %35 = tpu.matmul %32, %9, %cst_14 {dimension_numbers = #tpu.dot_dimension_numbers<[1], [0], [0], [1], [0, 0, 1, 1], [], []>} : vector<8x8xf32>, vector<8x8xf32>, vector<8x8xf32> -> vector<8x8xf32>
    %36 = vector.broadcast %34 : vector<8x1xf32> to vector<8x8xf32>
    %37 = arith.divf %35, %36 : vector<8x8xf32>
    %38 = vector.extract_strided_slice %7 {offsets = [0, 40], sizes = [8, 8], strides = [1, 1]} : vector<8x64xf32> to vector<8x8xf32>
    %39 = vector.extract_strided_slice %7 {offsets = [0, 56], sizes = [8, 8], strides = [1, 1]} : vector<8x64xf32> to vector<8x8xf32>
    %40 = vector.extract_strided_slice %7 {offsets = [0, 16], sizes = [8, 8], strides = [1, 1]} : vector<8x64xf32> to vector<8x8xf32>
    %cst_15 = arith.constant dense<0.000000e+00> : vector<8x8xf32>
    %41 = tpu.matmul %40, %38, %cst_15 {dimension_numbers = #tpu.dot_dimension_numbers<[1], [1], [0], [0], [0, 0, 1, 0], [], []>} : vector<8x8xf32>, vector<8x8xf32>, vector<8x8xf32> -> vector<8x8xf32>
    %cst_16 = arith.constant -1.000000e+30 : f32
    %42 = vector.broadcast %cst_16 : f32 to vector<8x8xf32>
    %43 = arith.select %6, %41, %42 : vector<8x8xi1>, vector<8x8xf32>
    %cst_17 = arith.constant dense<0xFF800000> : vector<8xf32>
    %44 = vector.multi_reduction <maximumf>, %43, %cst_17 [1] : vector<8x8xf32> to vector<8xf32>
    %45 = vector.shape_cast %44 : vector<8xf32> to vector<8x1xf32>
    %46 = vector.broadcast %45 : vector<8x1xf32> to vector<8x8xf32>
    %47 = arith.subf %43, %46 : vector<8x8xf32>
    %48 = math.exp %47 : vector<8x8xf32>
    %cst_18 = arith.constant dense<0.000000e+00> : vector<8xf32>
    %49 = vector.multi_reduction <add>, %48, %cst_18 [1] : vector<8x8xf32> to vector<8xf32>
    %50 = vector.shape_cast %49 : vector<8xf32> to vector<8x1xf32>
    %cst_19 = arith.constant dense<0.000000e+00> : vector<8x8xf32>
    %51 = tpu.matmul %48, %39, %cst_19 {dimension_numbers = #tpu.dot_dimension_numbers<[1], [0], [0], [1], [0, 0, 1, 1], [], []>} : vector<8x8xf32>, vector<8x8xf32>, vector<8x8xf32> -> vector<8x8xf32>
    %52 = vector.broadcast %50 : vector<8x1xf32> to vector<8x8xf32>
    %53 = arith.divf %51, %52 : vector<8x8xf32>
    %54 = vector.extract_strided_slice %7 {offsets = [0, 24], sizes = [8, 8], strides = [1, 1]} : vector<8x64xf32> to vector<8x8xf32>
    %cst_20 = arith.constant dense<0.000000e+00> : vector<8x8xf32>
    %55 = tpu.matmul %54, %38, %cst_20 {dimension_numbers = #tpu.dot_dimension_numbers<[1], [1], [0], [0], [0, 0, 1, 0], [], []>} : vector<8x8xf32>, vector<8x8xf32>, vector<8x8xf32> -> vector<8x8xf32>
    %cst_21 = arith.constant -1.000000e+30 : f32
    %56 = vector.broadcast %cst_21 : f32 to vector<8x8xf32>
    %57 = arith.select %6, %55, %56 : vector<8x8xi1>, vector<8x8xf32>
    %cst_22 = arith.constant dense<0xFF800000> : vector<8xf32>
    %58 = vector.multi_reduction <maximumf>, %57, %cst_22 [1] : vector<8x8xf32> to vector<8xf32>
    %59 = vector.shape_cast %58 : vector<8xf32> to vector<8x1xf32>
    %60 = vector.broadcast %59 : vector<8x1xf32> to vector<8x8xf32>
    %61 = arith.subf %57, %60 : vector<8x8xf32>
    %62 = math.exp %61 : vector<8x8xf32>
    %cst_23 = arith.constant dense<0.000000e+00> : vector<8xf32>
    %63 = vector.multi_reduction <add>, %62, %cst_23 [1] : vector<8x8xf32> to vector<8xf32>
    %64 = vector.shape_cast %63 : vector<8xf32> to vector<8x1xf32>
    %cst_24 = arith.constant dense<0.000000e+00> : vector<8x8xf32>
    %65 = tpu.matmul %62, %39, %cst_24 {dimension_numbers = #tpu.dot_dimension_numbers<[1], [0], [0], [1], [0, 0, 1, 1], [], []>} : vector<8x8xf32>, vector<8x8xf32>, vector<8x8xf32> -> vector<8x8xf32>
    %66 = vector.broadcast %64 : vector<8x1xf32> to vector<8x8xf32>
    %67 = arith.divf %65, %66 : vector<8x8xf32>
    %68 = tpu.concatenate %23, %37, %53, %67 in 1 : vector<8x8xf32>, vector<8x8xf32>, vector<8x8xf32>, vector<8x8xf32> -> vector<8x32xf32>
    %69 = vector.extract_strided_slice %3 {offsets = [8, 0], sizes = [8, 64], strides = [1, 1]} : vector<16x64xf32> to vector<8x64xf32>
    %70 = vector.extract_strided_slice %69 {offsets = [0, 32], sizes = [8, 8], strides = [1, 1]} : vector<8x64xf32> to vector<8x8xf32>
    %71 = vector.extract_strided_slice %69 {offsets = [0, 48], sizes = [8, 8], strides = [1, 1]} : vector<8x64xf32> to vector<8x8xf32>
    %72 = vector.extract_strided_slice %69 {offsets = [0, 0], sizes = [8, 8], strides = [1, 1]} : vector<8x64xf32> to vector<8x8xf32>
    %cst_25 = arith.constant dense<0.000000e+00> : vector<8x8xf32>
    %73 = tpu.matmul %72, %70, %cst_25 {dimension_numbers = #tpu.dot_dimension_numbers<[1], [1], [0], [0], [0, 0, 1, 0], [], []>} : vector<8x8xf32>, vector<8x8xf32>, vector<8x8xf32> -> vector<8x8xf32>
    %cst_26 = arith.constant -1.000000e+30 : f32
    %74 = vector.broadcast %cst_26 : f32 to vector<8x8xf32>
    %75 = arith.select %6, %73, %74 : vector<8x8xi1>, vector<8x8xf32>
    %cst_27 = arith.constant dense<0xFF800000> : vector<8xf32>
    %76 = vector.multi_reduction <maximumf>, %75, %cst_27 [1] : vector<8x8xf32> to vector<8xf32>
    %77 = vector.shape_cast %76 : vector<8xf32> to vector<8x1xf32>
    %78 = vector.broadcast %77 : vector<8x1xf32> to vector<8x8xf32>
    %79 = arith.subf %75, %78 : vector<8x8xf32>
    %80 = math.exp %79 : vector<8x8xf32>
    %cst_28 = arith.constant dense<0.000000e+00> : vector<8xf32>
    %81 = vector.multi_reduction <add>, %80, %cst_28 [1] : vector<8x8xf32> to vector<8xf32>
    %82 = vector.shape_cast %81 : vector<8xf32> to vector<8x1xf32>
    %cst_29 = arith.constant dense<0.000000e+00> : vector<8x8xf32>
    %83 = tpu.matmul %80, %71, %cst_29 {dimension_numbers = #tpu.dot_dimension_numbers<[1], [0], [0], [1], [0, 0, 1, 1], [], []>} : vector<8x8xf32>, vector<8x8xf32>, vector<8x8xf32> -> vector<8x8xf32>
    %84 = vector.broadcast %82 : vector<8x1xf32> to vector<8x8xf32>
    %85 = arith.divf %83, %84 : vector<8x8xf32>
    %86 = vector.extract_strided_slice %69 {offsets = [0, 8], sizes = [8, 8], strides = [1, 1]} : vector<8x64xf32> to vector<8x8xf32>
    %cst_30 = arith.constant dense<0.000000e+00> : vector<8x8xf32>
    %87 = tpu.matmul %86, %70, %cst_30 {dimension_numbers = #tpu.dot_dimension_numbers<[1], [1], [0], [0], [0, 0, 1, 0], [], []>} : vector<8x8xf32>, vector<8x8xf32>, vector<8x8xf32> -> vector<8x8xf32>
    %cst_31 = arith.constant -1.000000e+30 : f32
    %88 = vector.broadcast %cst_31 : f32 to vector<8x8xf32>
    %89 = arith.select %6, %87, %88 : vector<8x8xi1>, vector<8x8xf32>
    %cst_32 = arith.constant dense<0xFF800000> : vector<8xf32>
    %90 = vector.multi_reduction <maximumf>, %89, %cst_32 [1] : vector<8x8xf32> to vector<8xf32>
    %91 = vector.shape_cast %90 : vector<8xf32> to vector<8x1xf32>
    %92 = vector.broadcast %91 : vector<8x1xf32> to vector<8x8xf32>
    %93 = arith.subf %89, %92 : vector<8x8xf32>
    %94 = math.exp %93 : vector<8x8xf32>
    %cst_33 = arith.constant dense<0.000000e+00> : vector<8xf32>
    %95 = vector.multi_reduction <add>, %94, %cst_33 [1] : vector<8x8xf32> to vector<8xf32>
    %96 = vector.shape_cast %95 : vector<8xf32> to vector<8x1xf32>
    %cst_34 = arith.constant dense<0.000000e+00> : vector<8x8xf32>
    %97 = tpu.matmul %94, %71, %cst_34 {dimension_numbers = #tpu.dot_dimension_numbers<[1], [0], [0], [1], [0, 0, 1, 1], [], []>} : vector<8x8xf32>, vector<8x8xf32>, vector<8x8xf32> -> vector<8x8xf32>
    %98 = vector.broadcast %96 : vector<8x1xf32> to vector<8x8xf32>
    %99 = arith.divf %97, %98 : vector<8x8xf32>
    %100 = vector.extract_strided_slice %69 {offsets = [0, 40], sizes = [8, 8], strides = [1, 1]} : vector<8x64xf32> to vector<8x8xf32>
    %101 = vector.extract_strided_slice %69 {offsets = [0, 56], sizes = [8, 8], strides = [1, 1]} : vector<8x64xf32> to vector<8x8xf32>
    %102 = vector.extract_strided_slice %69 {offsets = [0, 16], sizes = [8, 8], strides = [1, 1]} : vector<8x64xf32> to vector<8x8xf32>
    %cst_35 = arith.constant dense<0.000000e+00> : vector<8x8xf32>
    %103 = tpu.matmul %102, %100, %cst_35 {dimension_numbers = #tpu.dot_dimension_numbers<[1], [1], [0], [0], [0, 0, 1, 0], [], []>} : vector<8x8xf32>, vector<8x8xf32>, vector<8x8xf32> -> vector<8x8xf32>
    %cst_36 = arith.constant -1.000000e+30 : f32
    %104 = vector.broadcast %cst_36 : f32 to vector<8x8xf32>
    %105 = arith.select %6, %103, %104 : vector<8x8xi1>, vector<8x8xf32>
    %cst_37 = arith.constant dense<0xFF800000> : vector<8xf32>
    %106 = vector.multi_reduction <maximumf>, %105, %cst_37 [1] : vector<8x8xf32> to vector<8xf32>
    %107 = vector.shape_cast %106 : vector<8xf32> to vector<8x1xf32>
    %108 = vector.broadcast %107 : vector<8x1xf32> to vector<8x8xf32>
    %109 = arith.subf %105, %108 : vector<8x8xf32>
    %110 = math.exp %109 : vector<8x8xf32>
    %cst_38 = arith.constant dense<0.000000e+00> : vector<8xf32>
    %111 = vector.multi_reduction <add>, %110, %cst_38 [1] : vector<8x8xf32> to vector<8xf32>
    %112 = vector.shape_cast %111 : vector<8xf32> to vector<8x1xf32>
    %cst_39 = arith.constant dense<0.000000e+00> : vector<8x8xf32>
    %113 = tpu.matmul %110, %101, %cst_39 {dimension_numbers = #tpu.dot_dimension_numbers<[1], [0], [0], [1], [0, 0, 1, 1], [], []>} : vector<8x8xf32>, vector<8x8xf32>, vector<8x8xf32> -> vector<8x8xf32>
    %114 = vector.broadcast %112 : vector<8x1xf32> to vector<8x8xf32>
    %115 = arith.divf %113, %114 : vector<8x8xf32>
    %116 = vector.extract_strided_slice %69 {offsets = [0, 24], sizes = [8, 8], strides = [1, 1]} : vector<8x64xf32> to vector<8x8xf32>
    %cst_40 = arith.constant dense<0.000000e+00> : vector<8x8xf32>
    %117 = tpu.matmul %116, %100, %cst_40 {dimension_numbers = #tpu.dot_dimension_numbers<[1], [1], [0], [0], [0, 0, 1, 0], [], []>} : vector<8x8xf32>, vector<8x8xf32>, vector<8x8xf32> -> vector<8x8xf32>
    %cst_41 = arith.constant -1.000000e+30 : f32
    %118 = vector.broadcast %cst_41 : f32 to vector<8x8xf32>
    %119 = arith.select %6, %117, %118 : vector<8x8xi1>, vector<8x8xf32>
    %cst_42 = arith.constant dense<0xFF800000> : vector<8xf32>
    %120 = vector.multi_reduction <maximumf>, %119, %cst_42 [1] : vector<8x8xf32> to vector<8xf32>
    %121 = vector.shape_cast %120 : vector<8xf32> to vector<8x1xf32>
    %122 = vector.broadcast %121 : vector<8x1xf32> to vector<8x8xf32>
    %123 = arith.subf %119, %122 : vector<8x8xf32>
    %124 = math.exp %123 : vector<8x8xf32>
    %cst_43 = arith.constant dense<0.000000e+00> : vector<8xf32>
    %125 = vector.multi_reduction <add>, %124, %cst_43 [1] : vector<8x8xf32> to vector<8xf32>
    %126 = vector.shape_cast %125 : vector<8xf32> to vector<8x1xf32>
    %cst_44 = arith.constant dense<0.000000e+00> : vector<8x8xf32>
    %127 = tpu.matmul %124, %101, %cst_44 {dimension_numbers = #tpu.dot_dimension_numbers<[1], [0], [0], [1], [0, 0, 1, 1], [], []>} : vector<8x8xf32>, vector<8x8xf32>, vector<8x8xf32> -> vector<8x8xf32>
    %128 = vector.broadcast %126 : vector<8x1xf32> to vector<8x8xf32>
    %129 = arith.divf %127, %128 : vector<8x8xf32>
    %130 = tpu.concatenate %85, %99, %115, %129 in 1 : vector<8x8xf32>, vector<8x8xf32>, vector<8x8xf32>, vector<8x8xf32> -> vector<8x32xf32>
    %131 = tpu.concatenate %68, %130 in 0 : vector<8x32xf32>, vector<8x32xf32> -> vector<16x32xf32>
    %cst_45 = arith.constant dense<0.000000e+00> : vector<16x32xf32>
    %132 = tpu.matmul %131, %2, %cst_45 {dimension_numbers = #tpu.dot_dimension_numbers<[1], [0], [0], [1], [0, 0, 1, 1], [], []>} : vector<16x32xf32>, vector<32x32xf32>, vector<16x32xf32> -> vector<16x32xf32>
    %c0_46 = arith.constant 0 : index
    %c0_47 = arith.constant 0 : index
    %133 = vector.load %arg3[%c0_46, %c0_47] : memref<16x32xf32, #tpu.memory_space<vmem>>, vector<16x32xf32>
    tpu.vector_store %arg3[%c0_46, %c0_47], %132 {strides = array<i32>} : memref<16x32xf32, #tpu.memory_space<vmem>>, vector<16x32xf32>,
    return
  }
}

</mosaic_0001>

<bundles_post_ra>
// kernel: tpu_custom_call.1
= control target key start
LH: loop header
LB: loop body
LE: loop exit
PB: predicated region body
PF: predicated region fallthrough
CT: control target
= control target key end

     0   :  { %8 = vsyncpa [#allocation3], 0  ;;  %s2186_s0 = inlined_call_operand.hbm [shape: f32[16,32], index: 0, kind: input, shape index: {}]   ;;  %s2187_s1 = inlined_call_operand.hbm [shape: f32[32,64], index: 1, kind: input, shape index: {}]   ;;  %s2188_s2 = inlined_call_operand.hbm [shape: f32[32,32], index: 2, kind: input, shape index: {}]   ;;  %s2189_s3 = inlined_call_operand.hbm [shape: f32[16,32], index: 3, kind: output, shape index: {}]  }
   0x1   :  { %9 = vsyncpa [#allocation6], 0 }
   0x2   :  { %10 = vsyncpa [#allocation4], 0  ;;  %s1918_s12 = smov [#allocation5]   ;;  %s1919_s14 = smov [#allocation2]  }
   0x3   :  { %s28_s13 = sshll.u32 %s1918_s12, 4  ;;  %s16_s15 = sshll.u32 %s1919_s14, 4  ;;  %s29_s13 = int_to_ptr.vmem [resolvable:$true] %s28_s13  ;;  %s1955_s15 = int_to_ptr.vmem [resolvable:$true] %s16_s15 }
   0x4   :  { %s1824_s18 = scalar_lea.hbm %s2187_s1, 512 }
   0x5   :  { %p1825_p0 = scmp.ne.s32.totalorder %s2187_s1, %s1824_s18  ;;  %p1828_p1 = scmp.lt.u32.totalorder %s1824_s18, %s2187_s1 }
   0x7   :  { %p1830_p2 = pnand %p1828_p1, %p1825_p0 }
   0x9   :  { %1833 = shalt.err (!%p1830_p2)
}
   0xa   :  { %s1834_s23 = scalar_lea.vmem %s29_s13, 512  ;;  %p1839_p4 = scmp.lt.s32.totalorder %s29_s13, %s29_s13 }
   0xb   :  { %p1835_p3 = scmp.ne.s32.totalorder %s29_s13, %s1834_s23  ;;  %p1840_p5 = scmp.lt.s32.totalorder %s1834_s23, %s1834_s23 }
   0xd   :  { %p1841_p6 = por %p1840_p5, %p1839_p4 }
   0xf   :  { %p1842_p7 = pnand %p1841_p6, %p1835_p3 }
  0x11   :  { %1845 = shalt.err (!%p1842_p7)
}
  0x12   :  { %s1920_s24 = smov 128   ;;  %s1921_s25 = smov 8  }
  0x13   :  { %34 = dma.hbm_to_vmem [thread:$0]  %s2187_s1, 512, %s29_s13, [#allocation6], %s1920_s24, %s1920_s24, %s1921_s25  }
  0x14   :  { %s1846_s30 = scalar_lea.hbm %s2186_s0, 256 }
  0x15   :  { %p1847_p8 = scmp.ne.s32.totalorder %s2186_s0, %s1846_s30  ;;  %p1850_p9 = scmp.lt.u32.totalorder %s1846_s30, %s2186_s0 }
  0x17   :  { %p1852_p10 = pnand %p1850_p9, %p1847_p8 }
  0x19   :  { %1855 = shalt.err (!%p1852_p10)
}
  0x1a   :  { %s1856_s8 = scalar_lea.vmem %s1955_s15, 256  ;;  %p1861_p12 = scmp.lt.s32.totalorder %s1955_s15, %s1955_s15 }
  0x1b   :  { %p1857_p11 = scmp.ne.s32.totalorder %s1955_s15, %s1856_s8  ;;  %p1862_p13 = scmp.lt.s32.totalorder %s1856_s8, %s1856_s8 }
  0x1d   :  { %p1863_p0 = por %p1862_p13, %p1861_p12 }
  0x1f   :  { %p1864_p1 = pnand %p1863_p0, %p1857_p11 }
  0x21   :  { %1867 = shalt.err (!%p1864_p1)
}
  0x22   :  { %22 = dma.hbm_to_vmem [thread:$0]  %s2186_s0, 256, %s1955_s15, [#allocation3], %s1920_s24, %s1920_s24, %s1921_s25  }
  0x23   :  { %s1922_s10 = smov [#allocation7]   ;;  %s1868_s14 = scalar_lea.hbm %s2188_s2, 512 }
  0x24   :  { %s40_s11 = sshll.u32 %s1922_s10, 4  ;;  %p1869_p2 = scmp.ne.s32.totalorder %s2188_s2, %s1868_s14  ;;  %s41_s11 = int_to_ptr.vmem [resolvable:$true] %s40_s11 }
  0x25   :  { %p1872_p3 = scmp.lt.u32.totalorder %s1868_s14, %s2188_s2 }
  0x27   :  { %p1874_p4 = pnand %p1872_p3, %p1869_p2 }
  0x29   :  { %1877 = shalt.err (!%p1874_p4)
}
  0x2a   :  { %s1878_s20 = scalar_lea.vmem %s41_s11, 512  ;;  %p1883_p6 = scmp.lt.s32.totalorder %s41_s11, %s41_s11 }
  0x2b   :  { %p1879_p5 = scmp.ne.s32.totalorder %s41_s11, %s1878_s20  ;;  %p1884_p7 = scmp.lt.s32.totalorder %s1878_s20, %s1878_s20 }
  0x2d   :  { %p1885_p8 = por %p1884_p7, %p1883_p6 }
  0x2f   :  { %p1886_p9 = pnand %p1885_p8, %p1879_p5 }
  0x31   :  { %1889 = shalt.err (!%p1886_p9)
}
  0x32   :  { %46 = dma.hbm_to_vmem [thread:$0]  %s2188_s2, 512, %s41_s11, [#allocation6], %s1920_s24, %s1920_s24, %s1921_s25  }
  0x33   :  { %1912 = dma.done.wait [#allocation3], 256  }
  0x34   :  { %1913 = vsyncadd [#allocation3], 4294967040 }
  0x35   :  { %1914 = dma.done.wait [#allocation6], 1024  }
  0x36   :  { %1915 = vsyncadd [#allocation6], 4294966272  ;;  %vm66_vm0 = vcmask 261120   ;;  %v58_v0 = vld [vmem:[#allocation5] sm:$0xff]  ;;  %v59_v1 = vld [vmem:[#allocation5 + $0x8] sm:$0xff]  ;;  %v1923_v8 = vmov 0.0   ;;  %v148_v21 = vlaneseq }
  0x37   :  { %v60_v2 = vld [vmem:[#allocation5 + $0x10] sm:$0xff]  ;;  %v1759_v3 = vpack.c.bf16 %v59_v1, %v58_v0  ;;  %v61_v4 = vld [vmem:[#allocation5 + $0x18] sm:$0xff]  ;;  %1668 = vmatprep.subr.mxu1 %v1923_v8  ;;  %vm1924_vm1 = vmmov 0   ;;  %s1925_s2 = smov 80   ;;  %s1926_s21 = smov 96   ;;  %vm156_vm2 = vcmask 64512  }
  0x38   :  { %v56_v5 = vld [vmem:[#allocation2] sm:$0xff]  ;;  %v1763_v6 = vpack.c.bf16 %v61_v4, %v60_v2  ;;  %v57_v7 = vld [vmem:[#allocation2 + $0x8] sm:$0xff]  ;;  %1670 = vmatprep.mubr.msk.f32.mxu1 %vm1924_vm1, %v1923_v8  ;;  %s1927_s22 = smov 120   ;;  %s1928_s23 = smov 88   ;;  %v149_v22 = vshrl.u32 %v148_v21, 7  ;;  %v151_v23 = vand.u32 127, %v148_v21 }
  0x39   :  { %1665 = vmatprep.mubr.msk.f32.mxu0 %vm66_vm0, %v56_v5  ;;  %1760 = vmatprep.subr.bf16.mxu0 %v1759_v3  ;;  %s1929_s26 = smov 112   ;;  %s1930_s27 = smov 104   ;;  %vm816_vm4 = vcmask 130048   ;;  %vm818_vm5 = vcmask 195584  }
  0x3a   :  { %1762 = vmatpush3.bf16.msra.mxu0 %v1759_v3  ;;  %vm2073_vm3 = vcmp.le.s32.totalorder %v151_v23, %v149_v22  ;;  %s1931_s28 = smov 72   ;;  %s1932_s29 = smov 16  }
  0x3b   :  { %1764 = vmatprep.subr.bf16.mxu0 %v1763_v6  ;;  %s1933_s30 = smov 24   ;;  %s1934_s4 = smov [#allocation8]  }
  0x3c   :  { %s1572_s5 = sshll.u32 %s1934_s4, 4  ;;  %s1573_s5 = int_to_ptr.vmem [resolvable:$true] %s1572_s5 }
  0x3d   :  { %s1890_s6 = scalar_lea.vmem %s1573_s5, 256  ;;  %p1895_p11 = scmp.lt.s32.totalorder %s1573_s5, %s1573_s5 }
  0x3e   :  { %1766 = vmatpush3.bf16.msra.mxu0 %v1763_v6  ;;  %p1891_p10 = scmp.ne.s32.totalorder %s1573_s5, %s1890_s6  ;;  %p1896_p12 = scmp.lt.s32.totalorder %s1890_s6, %s1890_s6 }
  0x3f   :  { %1688 = vmatprep.subr.mxu0 %v1923_v8 }
  0x40   :  { %p1897_p13 = por %p1896_p12, %p1895_p11 }
  0x41   :  { %1666 = vmatmul.mubr.msk.f32.vlgmr.msra.gmra.mrb[0].mxu0 %vm66_vm0, %v57_v7 }
  0x42   :  { %1690 = vmatprep.mubr.msk.f32.mxu0 %vm1924_vm1, %v1923_v8  ;;  %p1898_p0 = pnand %p1897_p13, %p1891_p10 }
 0x114   :  { %v2015_v9 = vpop.f32.mrb[0].mxu0 }
 0x115   :  { %v2017_v10 = vpop.f32.mrb[1].mxu0 }
 0x116   :  { %241 = vrot.lane.b32.xlu1 %v2017_v10, %s1925_s2  ;;  %154 = vrot.lane.b32.xlu0 %v2017_v10, %s1926_s21 }
 0x11a   :  { %319 = vrot.lane.b32.xlu1 %v2017_v10, %s1927_s22 }
 0x11e   :  { %480 = vrot.lane.b32.xlu1 %v2017_v10, %s1928_s23 }
 0x122   :  { %478 = vrot.lane.b32.xlu1 %v2017_v10, %s1929_s26 }
 0x126   :  { %644 = vrot.lane.b32.xlu1 %v2017_v10, %s1930_s27 }
 0x12a   :  { %821 = vrot.lane.b32.xlu1 %v2015_v9, %s1926_s21 }
 0x12e   :  { %985 = vrot.lane.b32.xlu1 %v2015_v9, %s1927_s22 }
 0x132   :  { %1146 = vrot.lane.b32.xlu1 %v2015_v9, %s1928_s23 }
 0x136   :  { %1144 = vrot.lane.b32.xlu1 %v2015_v9, %s1929_s26 }
 0x188   :  { %v2031_v11 = vpop.permute.xlu1 %241  ;;  %v2033_v12 = vpop.permute.xlu0 %154 }
 0x189   :  { %1669 = vmatpush3.xpose.msk.msra.mxu1 %vm156_vm2, %v2033_v12 }
 0x18a   :  { %1673 = vmatprep.subr.mxu1 %v1923_v8 }
 0x18c   :  { %v2038_v13 = vpop.permute.xlu1 %319  ;;  %1671 = vmatmul.mubr.msk.f32.vlgmr.msra.gmra.mrb[0].mxu1 %vm156_vm2, %v2017_v10 }
 0x18d   :  { %1674 = vmatpush3.msra.mxu1 %v2031_v11  ;;  %1675 = vmatprep.mubr.msk.f32.mxu1 %vm1924_vm1, %v1923_v8 }
 0x18e   :  { %1678 = vmatprep.subr.mxu1 %v1923_v8 }
 0x190   :  { %v481_v14 = vpop.permute.xlu1 %480 }
 0x191   :  { %1689 = vmatpush3.xpose.msk.msra.mxu0 %vm156_vm2, %v481_v14 }
 0x192   :  { %1698 = vmatprep.subr.mxu0 %v1923_v8 }
 0x194   :  { %v479_v15 = vpop.permute.xlu1 %478 }
 0x195   :  { %1691 = vmatmul.mubr.msk.f32.vlgmr.msra.gmra.mrb[2].mxu0 %vm156_vm2, %v479_v15 }
 0x196   :  { %1699 = vmatpush3.xpose.msk.msra.mxu0 %vm156_vm2, %v481_v14  ;;  %1700 = vmatprep.mubr.msk.f32.mxu0 %vm1924_vm1, %v1923_v8 }
 0x197   :  { %1708 = vmatprep.subr.mxu0 %v1923_v8 }
 0x198   :  { %v645_v16 = vpop.permute.xlu1 %644 }
 0x199   :  { %1701 = vmatmul.mubr.msk.f32.vlgmr.msra.gmra.mrb[4].mxu0 %vm156_vm2, %v645_v16 }
 0x19a   :  { %1710 = vmatprep.mubr.msk.f32.mxu0 %vm1924_vm1, %v1923_v8 }
 0x19c   :  { %v822_v17 = vpop.permute.xlu1 %821 }
 0x19d   :  { %1709 = vmatpush3.xpose.msk.msra.mxu0 %vm156_vm2, %v822_v17 }
 0x19e   :  { %1718 = vmatprep.subr.mxu0 %v1923_v8 }
 0x1a0   :  { %1711 = vmatmul.mubr.msk.f32.vlgmr.msra.gmra.mrb[6].mxu0 %vm156_vm2, %v2015_v9  ;;  %v986_v18 = vpop.permute.xlu1 %985 }
 0x1a1   :  { %1719 = vmatpush3.xpose.msk.msra.mxu0 %vm156_vm2, %v822_v17  ;;  %1720 = vmatprep.mubr.msk.f32.mxu0 %vm1924_vm1, %v1923_v8 }
 0x1a2   :  { %1728 = vmatprep.subr.mxu0 %v1923_v8 }
 0x1a4   :  { %1721 = vmatmul.mubr.msk.f32.vlgmr.msra.gmra.mrb[8].mxu0 %vm156_vm2, %v986_v18  ;;  %v1147_v19 = vpop.permute.xlu1 %1146 }
 0x1a5   :  { %1729 = vmatpush3.xpose.msk.msra.mxu0 %vm156_vm2, %v1147_v19  ;;  %1730 = vmatprep.mubr.msk.f32.mxu0 %vm1924_vm1, %v1923_v8 }
 0x1a6   :  { %1738 = vmatprep.subr.mxu0 %v1923_v8 }
 0x1a8   :  { %v1145_v20 = vpop.permute.xlu1 %1144 }
 0x1a9   :  { %1731 = vmatmul.mubr.msk.f32.vlgmr.msra.gmra.mrb[10].mxu0 %vm156_vm2, %v1145_v20 }
 0x1aa   :  { %1739 = vmatpush3.xpose.msk.msra.mxu0 %vm156_vm2, %v1147_v19  ;;  %1740 = vmatprep.mubr.msk.f32.mxu0 %vm1924_vm1, %v1923_v8 }
 0x25f   :  { %v227_v25 = vpop.f32.mrb[0].mxu1 }
 0x260   :  { %v231_v26 = vsel %vm2073_vm3, %v227_v25, -1e+30  ;;  %v1672_v27 = vpop.f32.mrb[1].mxu1 }
 0x261   :  { %v232_v28 = vsel %vm156_vm2, %v231_v26, -inf }
 0x262   :  { %233 = vmax.xlane.f32.xlu0 %v232_v28 }
 0x268   :  { %v552_v29 = vpop.f32.mrb[2].mxu0 }
 0x269   :  { %v1692_v30 = vpop.f32.mrb[3].mxu0  ;;  %v556_v47 = vsel %vm2073_vm3, %v552_v29, -1e+30 }
 0x26a   :  { %v557_v48 = vsel %vm156_vm2, %v556_v47, -inf }
 0x26c   :  { %v714_v31 = vpop.f32.mrb[4].mxu0 }
 0x26d   :  { %v2082_v32 = vsel %vm2073_vm3, %v714_v31, -1e+30  ;;  %v1702_v33 = vpop.f32.mrb[5].mxu0 }
 0x26e   :  { %v719_v34 = vsel %vm156_vm2, %v2082_v32, -inf }
 0x26f   :  { %720 = vmax.xlane.f32.xlu1 %v719_v34 }
 0x273   :  { %v893_v35 = vpop.f32.mrb[6].mxu0 }
 0x274   :  { %v2088_v36 = vsel %vm2073_vm3, %v893_v35, -1e+30  ;;  %v1712_v37 = vpop.f32.mrb[7].mxu0 }
 0x275   :  { %v898_v38 = vsel %vm156_vm2, %v2088_v36, -inf }
 0x276   :  { %899 = vmax.xlane.f32.xlu1 %v898_v38 }
 0x277   :  { %v1055_v39 = vpop.f32.mrb[8].mxu0 }
 0x278   :  { %v1059_v40 = vsel %vm2073_vm3, %v1055_v39, -1e+30  ;;  %v1722_v41 = vpop.f32.mrb[9].mxu0  ;;  %1310 = vrot.lane.b32.xlu0 %v2015_v9, %s1930_s27 }
 0x279   :  { %v1060_v42 = vsel %vm156_vm2, %v1059_v40, -inf }
 0x27a   :  { %1061 = vmax.xlane.f32.xlu1 %v1060_v42 }
 0x27c   :  { %v1218_v43 = vpop.f32.mrb[10].mxu0 }
 0x27d   :  { %v1222_v44 = vsel %vm2073_vm3, %v1218_v43, -1e+30  ;;  %v1732_v45 = vpop.f32.mrb[11].mxu0 }
 0x27e   :  { %v1223_v46 = vsel %vm156_vm2, %v1222_v44, -inf }
 0x27f   :  { %1224 = vmax.xlane.f32.xlu1 %v1223_v46 }
 0x297   :  { %558 = vmax.xlane.f32.xlu0 %v557_v48 }
 0x2ef   :  { %v234_v49 = vpop.xlane.xlu0 %233 }
 0x2f0   :  { %v235_v50 = vsub.f32 %v231_v26, %v234_v49 }
 0x2f2   :  { %v236_v51 = vmul.f32 1.442695, %v235_v50 }
 0x2f3   :  { %v1311_v52 = vpop.permute.xlu0 %1310 }
 0x2f4   :  { %1792 = vpow2.f32 %v236_v51  ;;  %1741 = vmatmul.mubr.msk.f32.vlgmr.msra.gmra.mrb[12].mxu0 %vm156_vm2, %v1311_v52  ;;  %v63_v52 = vld [vmem:[#allocation7 + $0x8] sm:$0xff] }
 0x2fc   :  { %v721_v0 = vpop.xlane.xlu1 %720 }
 0x2fd   :  { %v722_v15 = vsub.f32 %v2082_v32, %v721_v0 }
 0x2fe   :  { %v1793_v53 = vpop.eup %1792 }
 0x2ff   :  { %1676 = vmatmul.mubr.msk.f32.vlgmr.msra.gmra.mrb[2].mxu1 %vm156_vm2, %v1793_v53  ;;  %v723_v18 = vmul.f32 1.442695, %v722_v15  ;;  %v238_v20 = vsel %vm156_vm2, %v1793_v53, 0.0 }
 0x300   :  { %1679 = vmatpush3.xpose.msk.msra.mxu1 %vm156_vm2, %v2033_v12  ;;  %1680 = vmatprep.mubr.msk.f32.mxu1 %vm1924_vm1, %v1923_v8 }
 0x301   :  { %1683 = vmatprep.subr.mxu1 %v1923_v8 }
 0x303   :  { %1681 = vmatmul.mubr.msk.f32.vlgmr.msra.gmra.mrb[4].mxu1 %vm156_vm2, %v2038_v13  ;;  %v900_v1 = vpop.xlane.xlu1 %899 }
 0x304   :  { %1684 = vmatpush3.msra.mxu1 %v2031_v11  ;;  %1685 = vmatprep.mubr.msk.f32.mxu1 %vm1924_vm1, %v1923_v8  ;;  %v901_v27 = vsub.f32 %v2088_v36, %v900_v1 }
 0x305   :  { %1693 = vmatprep.subr.mxu1 %v1923_v8 }
 0x306   :  { %v902_v30 = vmul.f32 1.442695, %v901_v27 }
 0x307   :  { %v1062_v3 = vpop.xlane.xlu1 %1061 }
 0x308   :  { %v1063_v5 = vsub.f32 %v1059_v40, %v1062_v3 }
 0x30a   :  { %v1064_v11 = vmul.f32 1.442695, %v1063_v5 }
 0x30c   :  { %v1225_v7 = vpop.xlane.xlu1 %1224 }
 0x30d   :  { %v1226_v12 = vsub.f32 %v1222_v44, %v1225_v7 }
 0x30f   :  { %v1227_v13 = vmul.f32 1.442695, %v1226_v12 }
 0x324   :  { %v559_v2 = vpop.xlane.xlu0 %558 }
 0x325   :  { %v560_v4 = vsub.f32 %v556_v47, %v559_v2 }
 0x327   :  { %v561_v6 = vmul.f32 1.442695, %v560_v4 }
 0x329   :  { %1794 = vpow2.f32 %v561_v6 }
 0x32a   :  { %1796 = vpow2.f32 %v1064_v11 }
 0x32b   :  { %1798 = vpow2.f32 %v1227_v13 }
 0x32c   :  { %1800 = vpow2.f32 %v723_v18 }
 0x333   :  { %v1795_v14 = vpop.eup %1794 }
 0x334   :  { %v563_v16 = vsel %vm156_vm2, %v1795_v14, 0.0  ;;  %v1797_v17 = vpop.eup %1796 }
 0x335   :  { %v1799_v19 = vpop.eup %1798 }
 0x336   :  { %v1801_v21 = vpop.eup %1800 }
 0x337   :  { %v725_v22 = vsel %vm156_vm2, %v1801_v21, 0.0 }
 0x3c7   :  { %v1380_v54 = vpop.f32.mrb[12].mxu0 }
 0x3c8   :  { %v1384_v55 = vsel %vm2073_vm3, %v1380_v54, -1e+30  ;;  %v1742_v56 = vpop.f32.mrb[13].mxu0 }
 0x3c9   :  { %v1385_v57 = vsel %vm156_vm2, %v1384_v55, -inf }
 0x3ca   :  { %1386 = vmax.xlane.f32.xlu0 %v1385_v57 }
 0x3d2   :  { %v2119_v58 = vpop.f32.mrb[2].mxu1 }
 0x3d3   :  { %v1677_v59 = vpop.f32.mrb[3].mxu1 }
 0x3d6   :  { %v389_v60 = vpop.f32.mrb[4].mxu1 }
 0x3d7   :  { %v393_v61 = vsel %vm2073_vm3, %v389_v60, -1e+30  ;;  %v1682_v62 = vpop.f32.mrb[5].mxu1  ;;  %v64_v60 = vld [vmem:[#allocation7 + $0x10] sm:$0xff] }
 0x3d8   :  { %v394_v63 = vsel %vm156_vm2, %v393_v61, -inf }
 0x3d9   :  { %395 = vmax.xlane.f32.xlu1 %v394_v63 }
 0x3e0   :  { %907 = vrot.lane.b32.xlu0 %v2015_v9, %s1925_s2 }
 0x3ea   :  { %566 = vrot.lane.b32.xlu1 %v2017_v10, %s1931_s28  ;;  %v1066_v10 = vsel %vm156_vm2, %v1797_v17, 0.0 }
 0x3ee   :  { %1232 = vrot.lane.b32.xlu1 %v2015_v9, %s1931_s28  ;;  %v1229_v9 = vsel %vm156_vm2, %v1799_v19, 0.0 }
 0x3ff   :  { %564 = vadd.xlane.f32.xlu0 %v563_v16 }
 0x403   :  { %1067 = vadd.xlane.f32.xlu0 %v1066_v10 }
 0x407   :  { %1230 = vadd.xlane.f32.xlu0 %v1229_v9 }
 0x40b   :  { %239 = vadd.xlane.f32.xlu0 %v238_v20 }
 0x412   :  { %726 = vadd.xlane.f32.xlu1 %v725_v22 }
 0x457   :  { %v1387_v23 = vpop.xlane.xlu0 %1386 }
 0x458   :  { %v1388_v24 = vsub.f32 %v1384_v55, %v1387_v23 }
 0x45a   :  { %v1389_v28 = vmul.f32 1.442695, %v1388_v24 }
 0x45b   :  { %v908_v37 = vpop.permute.xlu0 %907 }
 0x466   :  { %v396_v25 = vpop.xlane.xlu1 %395 }
 0x467   :  { %v397_v26 = vsub.f32 %v393_v61, %v396_v25  ;;  %v65_v61 = vld [vmem:[#allocation7 + $0x18] sm:$0xff] }
 0x468   :  { %v1771_v62 = vpack.c.bf16 %v65_v61, %v64_v60 }
 0x469   :  { %v398_v29 = vmul.f32 1.442695, %v397_v26 }
 0x46a   :  { %v567_v32 = vpop.permute.xlu1 %566 }
 0x46b   :  { %1802 = vpow2.f32 %v398_v29 }
 0x46c   :  { %1804 = vpow2.f32 %v1389_v28 }
 0x46d   :  { %1806 = vpow2.f32 %v902_v30 }
 0x46e   :  { %v1233_v39 = vpop.permute.xlu1 %1232 }
 0x475   :  { %v1803_v31 = vpop.eup %1802 }
 0x476   :  { %1686 = vmatmul.mubr.msk.f32.vlgmr.msra.gmra.mrb[6].mxu1 %vm156_vm2, %v1803_v31  ;;  %v400_v33 = vsel %vm156_vm2, %v1803_v31, 0.0  ;;  %v1805_v34 = vpop.eup %1804 }
 0x477   :  { %1694 = vmatpush3.msra.mxu1 %v567_v32  ;;  %401 = vadd.xlane.f32.xlu1 %v400_v33  ;;  %v1391_v35 = vsel %vm156_vm2, %v1805_v34, 0.0  ;;  %v1807_v36 = vpop.eup %1806 }
 0x478   :  { %1695 = vmatprep.mubr.msk.f32.mxu1 %vm1924_vm1, %v1923_v8  ;;  %1703 = vmatprep.subr.mxu1 %v1923_v8  ;;  %v904_v38 = vsel %vm156_vm2, %v1807_v36, 0.0 }
 0x47a   :  { %1696 = vmatmul.mubr.msk.f32.vlgmr.msra.gmra.mrb[8].mxu1 %vm156_vm2, %v1795_v14 }
 0x47b   :  { %1704 = vmatpush3.msra.mxu1 %v567_v32  ;;  %1392 = vadd.xlane.f32.xlu1 %v1391_v35 }
 0x47c   :  { %1705 = vmatprep.mubr.msk.f32.mxu1 %vm1924_vm1, %v1923_v8  ;;  %1713 = vmatprep.subr.mxu1 %v1923_v8 }
 0x47e   :  { %1706 = vmatmul.mubr.msk.f32.vlgmr.msra.gmra.mrb[10].mxu1 %vm156_vm2, %v1801_v21 }
 0x47f   :  { %1714 = vmatpush3.msra.mxu1 %v908_v37  ;;  %905 = vadd.xlane.f32.xlu1 %v904_v38 }
 0x480   :  { %1715 = vmatprep.mubr.msk.f32.mxu1 %vm1924_vm1, %v1923_v8  ;;  %1723 = vmatprep.subr.mxu1 %v1923_v8 }
 0x482   :  { %1716 = vmatmul.mubr.msk.f32.vlgmr.msra.gmra.mrb[12].mxu1 %vm156_vm2, %v1807_v36 }
 0x483   :  { %1724 = vmatpush3.msra.mxu1 %v908_v37  ;;  %1725 = vmatprep.mubr.msk.f32.mxu1 %vm1924_vm1, %v1923_v8 }
 0x484   :  { %1733 = vmatprep.subr.mxu1 %v1923_v8 }
 0x486   :  { %1726 = vmatmul.mubr.msk.f32.vlgmr.msra.gmra.mrb[14].mxu1 %vm156_vm2, %v1797_v17 }
 0x487   :  { %1734 = vmatpush3.msra.mxu1 %v1233_v39  ;;  %1735 = vmatprep.mubr.msk.f32.mxu1 %vm1924_vm1, %v1923_v8 }
 0x488   :  { %1743 = vmatprep.subr.mxu1 %v1923_v8 }
 0x48a   :  { %1736 = vmatmul.mubr.msk.f32.vlgmr.msra.gmra.mrb[16].mxu1 %vm156_vm2, %v1799_v19 }
 0x48b   :  { %1744 = vmatpush3.msra.mxu1 %v1233_v39  ;;  %1745 = vmatprep.mubr.msk.f32.mxu1 %vm1924_vm1, %v1923_v8  ;;  %v62_v8 = vld [vmem:[#allocation7] sm:$0xff] }
 0x48c   :  { %v565_v42 = vpop.xlane.xlu0 %564  ;;  %v1767_v53 = vpack.c.bf16 %v63_v52, %v62_v8 }
 0x48e   :  { %1746 = vmatmul.mubr.msk.f32.vlgmr.msra.gmra.mrb[18].mxu1 %vm156_vm2, %v1805_v34  ;;  %1768 = vmatprep.subr.bf16.mxu0 %v1767_v53 }
 0x48f   :  { %1770 = vmatpush3.bf16.msra.mxu0 %v1767_v53 }
 0x490   :  { %v1068_v45 = vpop.xlane.xlu0 %1067  ;;  %1772 = vmatprep.subr.bf16.mxu0 %v1771_v62 }
 0x493   :  { %1774 = vmatpush3.bf16.msra.mxu0 %v1771_v62 }
 0x494   :  { %v1231_v54 = vpop.xlane.xlu0 %1230 }
 0x498   :  { %v240_v17 = vpop.xlane.xlu0 %239 }
 0x49f   :  { %v727_v40 = vpop.xlane.xlu1 %726 }
 0x504   :  { %v402_v41 = vpop.xlane.xlu1 %401 }
 0x505   :  { %1808 = vrcp.f32 %v402_v41 }
 0x506   :  { %1810 = vrcp.f32 %v565_v42 }
 0x507   :  { %1812 = vrcp.f32 %v727_v40 }
 0x508   :  { %1814 = vrcp.f32 %v1068_v45  ;;  %v1393_v63 = vpop.xlane.xlu1 %1392 }
 0x509   :  { %1816 = vrcp.f32 %v1231_v54 }
 0x50a   :  { %1818 = vrcp.f32 %v1393_v63 }
 0x50b   :  { %1820 = vrcp.f32 %v240_v17 }
 0x50c   :  { %v906_v18 = vpop.xlane.xlu1 %905 }
 0x50d   :  { %1822 = vrcp.f32 %v906_v18 }
 0x50f   :  { %v1809_v43 = vpop.eup %1808 }
 0x510   :  { %v1811_v48 = vpop.eup %1810 }
 0x511   :  { %v1813_v55 = vpop.eup %1812 }
 0x512   :  { %v1815_v2 = vpop.eup %1814 }
 0x513   :  { %v1817_v6 = vpop.eup %1816 }
 0x514   :  { %v1819_v13 = vpop.eup %1818 }
 0x515   :  { %v1821_v10 = vpop.eup %1820 }
 0x516   :  { %v318_v20 = vmul.f32 %v1821_v10, %v2119_v58 }
 0x517   :  { %v1823_v25 = vpop.eup %1822 }
 0x549   :  { %v472_v44 = vpop.f32.mrb[6].mxu1 }
 0x54a   :  { %v477_v46 = vmul.f32 %v1809_v43, %v472_v44  ;;  %v1687_v47 = vpop.f32.mrb[7].mxu1 }
 0x54c   :  { %804 = vrot.lane.b32.xlu0 %v477_v46, %s1921_s25 }
 0x54d   :  { %v638_v49 = vpop.f32.mrb[8].mxu1 }
 0x54e   :  { %v643_v50 = vmul.f32 %v1811_v48, %v638_v49  ;;  %v1697_v51 = vpop.f32.mrb[9].mxu1 }
 0x550   :  { %808 = vrot.lane.b32.xlu1 %v643_v50, %s1932_s29 }
 0x551   :  { %v797_v56 = vpop.f32.mrb[10].mxu1 }
 0x552   :  { %v802_v57 = vmul.f32 %v1813_v55, %v797_v56  ;;  %v1707_v59 = vpop.f32.mrb[11].mxu1 }
 0x554   :  { %812 = vrot.lane.b32.xlu1 %v802_v57, %s1933_s30 }
 0x555   :  { %v979_v0 = vpop.f32.mrb[12].mxu1 }
 0x556   :  { %v1717_v1 = vpop.f32.mrb[13].mxu1  ;;  %v984_v27 = vmul.f32 %v1823_v25, %v979_v0 }
 0x559   :  { %v1138_v3 = vpop.f32.mrb[14].mxu1 }
 0x55a   :  { %v1143_v4 = vmul.f32 %v1815_v2, %v1138_v3  ;;  %v1727_v5 = vpop.f32.mrb[15].mxu1 }
 0x55c   :  { %1470 = vrot.lane.b32.xlu1 %v1143_v4, %s1921_s25 }
 0x55d   :  { %v1304_v7 = vpop.f32.mrb[16].mxu1 }
 0x55e   :  { %v1309_v11 = vmul.f32 %v1817_v6, %v1304_v7  ;;  %v1737_v12 = vpop.f32.mrb[17].mxu1 }
 0x560   :  { %1474 = vrot.lane.b32.xlu0 %v1309_v11, %s1932_s29 }
 0x561   :  { %v1463_v14 = vpop.f32.mrb[18].mxu1 }
 0x562   :  { %v1468_v15 = vmul.f32 %v1819_v13, %v1463_v14  ;;  %v1747_v16 = vpop.f32.mrb[19].mxu1 }
 0x564   :  { %1478 = vrot.lane.b32.xlu1 %v1468_v15, %s1933_s30 }
 0x5be   :  { %v805_v19 = vpop.permute.xlu0 %804 }
 0x5bf   :  { %v815_v21 = vsel %vm156_vm2, %v318_v20, %v805_v19 }
 0x5c2   :  { %v809_v9 = vpop.permute.xlu1 %808 }
 0x5c3   :  { %v817_v22 = vsel %vm816_vm4, %v815_v21, %v809_v9 }
 0x5c6   :  { %v813_v23 = vpop.permute.xlu1 %812 }
 0x5c7   :  { %v819_v24 = vsel %vm818_vm5, %v817_v22, %v813_v23 }
 0x5c8   :  { %1756 = vmatprep.mubr.msk.f32.mxu0 %vm66_vm0, %v819_v24 }
 0x5ce   :  { %v1471_v26 = vpop.permute.xlu1 %1470 }
 0x5cf   :  { %v1481_v29 = vsel %vm156_vm2, %v984_v27, %v1471_v26 }
 0x5d2   :  { %v1475_v28 = vpop.permute.xlu0 %1474 }
 0x5d3   :  { %v1482_v30 = vsel %vm816_vm4, %v1481_v29, %v1475_v28 }
 0x5d6   :  { %v1479_v31 = vpop.permute.xlu1 %1478 }
 0x5d7   :  { %v1483_v32 = vsel %vm818_vm5, %v1482_v30, %v1479_v31 }
 0x5d8   :  { %1757 = vmatmul.mubr.msk.f32.vlgmr.msra.gmra.mrb[14].mxu0 %vm66_vm0, %v1483_v32 }
 0x6ab   :  { %v1758_v58 = vpop.f32.mrb[14].mxu0 }
 0x6ac   :  { %1566 = vst.msk [vmem:[#allocation8 + $0x8] sm:$0xff] %vm66_vm0, %v1758_v58  ;;  %v1556_v33 = vpop.f32.mrb[15].mxu0 }
 0x6ad   :  { %1565 = vst.msk [vmem:[#allocation8] sm:$0xff] %vm66_vm0, %v1556_v33 }
 0x6ae   :  { %1901 = shalt.err (!%p1898_p0)
}
 0x6af   :  { %s1902_s1 = scalar_lea.hbm %s2189_s3, 256 }
 0x6b0   :  { %p1903_p1 = scmp.ne.s32.totalorder %s2189_s3, %s1902_s1  ;;  %p1906_p2 = scmp.lt.u32.totalorder %s1902_s1, %s2189_s3 }
 0x6b2   :  { %p1908_p3 = pnand %p1906_p2, %p1903_p1 }
 0x6b4   :  { %1911 = shalt.err (!%p1908_p3)
}
 0x6b5   :  { %1578 = dma.vmem_to_hbm [thread:$0]  %s1573_s5, 256, %s2189_s3, [#allocation4], %s1920_s24, %s1920_s24, %s1921_s25  }
 0x6b6   :  { %1916 = dma.done.wait [#allocation4], 256  }
 0x6b7   :  { %1917 = vsyncadd [#allocation4], 4294967040 }
 0x6b8   :  { %1582 = vsyncpa [#allocation3], 1 }
 0x6b9   :  { %1583 = vsyncpa [#allocation6], 1 }
 0x6ba   :  { %1584 = vsyncpa [#allocation4], 1 }

</bundles_post_ra>
